<compile_context>
chip_gen: v7x
topology: tpu7x:2x2x1
jax: 0.10.0
libtpu: 0.0.40
codegen_flags: <defaults>
</compile_context>

<pallas_src>
from typing import NamedTuple

import jax
import jax.numpy as jnp
from jax.experimental import pallas as pl
from jax.experimental.pallas import tpu as pltpu


# -----------------------------------------------------------------------------
# Hardware / tiling helpers
# -----------------------------------------------------------------------------
def _round_up(x: int, m: int) -> int:
    return (x + m - 1) // m * m


def _vmem_capacity_bytes() -> int:
    """Per-core VMEM capacity; conservative 64 MiB (v7x) fallback."""
    try:
        info = pltpu.get_tpu_info()
        cap = getattr(info, "vmem_capacity_bytes", None)
        if cap:
            return int(cap)
    except Exception:
        pass
    return 64 * 1024 * 1024


def _weight_budget_bytes() -> int:
    # ~55% of per-core VMEM for the double-buffered fused weight block; the rest is
    # left for LHS / bias / c / output / accumulator buffers and compiler scratch.
    return int(0.55 * _vmem_capacity_bytes())


def _pick_tn(n_pad: int, k_full: int, itemsize: int) -> int:
    """Largest lane tile (multiple of 128 dividing n_pad) whose double-buffered fused
    weight block (k_full, 4*tn) fits the budget.  Keeps >=2 N-tiles whenever possible
    so the 'parallel' grid axis can shard across both v7x TensorCores."""
    budget = _weight_budget_bytes()
    cands = [t for t in range(n_pad, 0, -128) if n_pad % t == 0] or [n_pad]
    if n_pad >= 256:
        cands = [t for t in cands if t <= n_pad // 2] or [128]
    for t in cands:
        if 2 * k_full * 4 * t * itemsize <= budget:
            return t
    # Even the smallest N tile does not fit with the full K slab: return it anyway;
    # the contraction is split over a K grid axis at call time (never exceeds budget).
    return cands[-1]


def _pick_tk(k_eff: int, k_pad: int, tn: int, itemsize: int) -> int:
    """Largest K chunk whose double-buffered fused weight block fits the budget."""
    budget = _weight_budget_bytes()

    def fits(tk):
        return 2 * tk * 4 * tn * itemsize <= budget

    if fits(k_eff):
        return k_eff                      # no K split (common case)
    for t in range(k_pad, 127, -128):     # divisors of k_pad, multiples of 128
        if k_pad % t == 0 and k_eff % t == 0 and fits(t):
            return t
    return 128                            # floor: 128x(4*tn) always fits any budget


# -----------------------------------------------------------------------------
# Kernel: one (N-tile, K-tile) grid step of the fused LSTM cell update
# -----------------------------------------------------------------------------
def _lstm_gates_kernel(lhs_ref, c_ref, bias_ref, w_ref, out_ref, acc_ref):
    """
    lhs_ref : (B, tk)        bf16/f32  K-chunk of [x | h_broadcast] (or just x if h==0)
    c_ref   : (1, tn)        f32       previous cell state tile (broadcast over batch)
    bias_ref: (1, 4*tn)      f32       fused b_ih + b_hh for this tile (gate-major)
    w_ref   : (tk, 4*tn)     bf16/f32  fused tile-major weight chunk
    out_ref : (2, B, tn)     f32       out[0] = c_new, out[1] = h_new
    acc_ref : (B, 4*tn)      f32       scratch accumulator (persists over K axis)
    """
    kk = pl.program_id(1)

    @pl.when(kk == 0)
    def _():
        acc_ref[...] = jnp.zeros_like(acc_ref)

    # Single fused MXU dot per grid step: all four gates at once, f32 accumulation.
    acc_ref[...] += jnp.dot(lhs_ref[...], w_ref[...],
                            preferred_element_type=jnp.float32)

    @pl.when(kk == pl.num_programs(1) - 1)
    def _():
        tn = out_ref.shape[2]
        gates = acc_ref[...] + bias_ref[...]            # (B, 4*tn); bias bcast over B
        # Gate slices at multiples of tn (>=128) are vreg-aligned.
        i_g = jax.nn.sigmoid(gates[:, 0 * tn:1 * tn])
        f_g = jax.nn.sigmoid(gates[:, 1 * tn:2 * tn])
        g_g = jnp.tanh(gates[:, 2 * tn:3 * tn])
        o_g = jax.nn.sigmoid(gates[:, 3 * tn:4 * tn])
        c_new = f_g * c_ref[...] + i_g * g_g            # c (1, tn) bcast over batch
        out_ref[0, :, :] = c_new
        out_ref[1, :, :] = o_g * jnp.tanh(c_new)


# -----------------------------------------------------------------------------
# One-time parameter preparation (hoisted out of the per-call path)
# -----------------------------------------------------------------------------
class MultiDimLSTMParams(NamedTuple):
    w: jax.Array      # (2*k_pad, n_tiles*4*tn)  fused tile-major weights
    bias: jax.Array   # (1, n_tiles*4*tn)        fused b_ih + b_hh, f32
    k: int
    n: int
    k_pad: int
    n_pad: int
    tn: int


def prepare_multi_dim_lstm_params(weight_ih, weight_hh, bias_ih, bias_hh,
                                  compute_dtype=jnp.bfloat16) -> MultiDimLSTMParams:
    """Pads K/N to multiples of 128 and relays the weights out tile-major:
    for N-tile j, columns [j*4*tn, (j+1)*4*tn) hold all four gates' weights for that
    tile contiguously (gate-major within the tile).  Rows [0:k_pad] are W_ih, rows
    [k_pad:2*k_pad] are W_hh, so the zero-hidden path can skip the W_hh half."""
    g, d1, d2, h1, h2 = weight_ih.shape
    assert g == 4
    assert (d1, d2) == (h1, h2), "module semantics require hidden_dim == input_dim"
    k = d1 * d2
    n = h1 * h2
    k_pad = _round_up(k, 128)
    n_pad = _round_up(n, 128)
    itemsize = jnp.dtype(compute_dtype).itemsize
    tn = _pick_tn(n_pad, 2 * k_pad, itemsize)
    n_tiles = n_pad // tn

    def pad_w(w):
        w = w.reshape(4, k, n)
        return jnp.pad(w, ((0, 0), (0, k_pad - k), (0, n_pad - n)))

    w = jnp.concatenate([pad_w(weight_ih), pad_w(weight_hh)], axis=1)  # (4, 2*k_pad, n_pad)
    w = w.reshape(4, 2 * k_pad, n_tiles, tn)
    w = jnp.transpose(w, (1, 2, 0, 3)).reshape(2 * k_pad, n_tiles * 4 * tn)
    w_fused = w.astype(compute_dtype)

    bias = (bias_ih + bias_hh).reshape(4, n).astype(jnp.float32)
    bias = jnp.pad(bias, ((0, 0), (0, n_pad - n)))
    bias = bias.reshape(4, n_tiles, tn)
    bias = jnp.transpose(bias, (1, 0, 2)).reshape(1, n_tiles * 4 * tn)

    return MultiDimLSTMParams(w_fused, bias, k, n, k_pad, n_pad, tn)


# -----------------------------------------------------------------------------
# Forward pass
# -----------------------------------------------------------------------------
def multi_dim_lstm_cell(x, params: MultiDimLSTMParams, hidden_state=None):
    """x: (B, D1, D2); params from prepare_multi_dim_lstm_params.
    Returns (h, c), each (B, D1, D2) float32 -- same as the PyTorch module."""
    b, d1, d2 = x.shape
    k = d1 * d2
    assert k == params.k, "input dims do not match the prepared parameters"
    n, k_pad, n_pad, tn = params.n, params.k_pad, params.n_pad, params.tn
    compute_dtype = params.w.dtype
    itemsize = jnp.dtype(compute_dtype).itemsize
    n_tiles = n_pad // tn

    x_flat = x.reshape(b, k)
    if k_pad > k:
        x_flat = jnp.pad(x_flat, ((0, 0), (0, k_pad - k)))

    if hidden_state is None:
        # h == 0: skip the W_hh half entirely -- only rows [0:k_pad] of the fused
        # weight are ever DMA'd, halving the dominant weight traffic for this call.
        lhs = x_flat.astype(compute_dtype)
        k_eff = k_pad
        c_flat = jnp.zeros((1, n_pad), jnp.float32)
    else:
        h0, c0 = hidden_state
        h_flat = h0.reshape(1, n).astype(jnp.float32)
        c_flat = c0.reshape(1, n).astype(jnp.float32)
        if n_pad > n:
            h_flat = jnp.pad(h_flat, ((0, 0), (0, n_pad - n)))
            c_flat = jnp.pad(c_flat, ((0, 0), (0, n_pad - n)))
        # Fuse the two tensordots: broadcast the unbatched h over batch, stack along K.
        h_b = jnp.broadcast_to(h_flat, (b, n_pad))      # n_pad == k_pad here
        lhs = jnp.concatenate([x_flat, h_b], axis=1).astype(compute_dtype)
        k_eff = 2 * k_pad

    tk = _pick_tk(k_eff, k_pad, tn, itemsize)
    k_tiles = k_eff // tk

    # VMEM limit derived from the actual (double-buffered) block sizes + headroom,
    # clamped to the chip's physical per-core VMEM (generation-aware).
    w_block = tk * 4 * tn * itemsize
    lhs_block = b * tk * itemsize
    small_blocks = tn * 4 + 4 * tn * 4 + 2 * b * tn * 4      # c + bias + out tiles
    acc_block = b * 4 * tn * 4
    vmem_limit = min(
        _vmem_capacity_bytes(),
        max(2 * (w_block + lhs_block + small_blocks) + acc_block + 8 * 1024 * 1024,
            16 * 1024 * 1024))

    out = pl.pallas_call(
        _lstm_gates_kernel,
        out_shape=jax.ShapeDtypeStruct((2, b, n_pad), jnp.float32),
        grid_spec=pltpu.PrefetchScalarGridSpec(
            num_scalar_prefetch=0,
            grid=(n_tiles, k_tiles),                              # reduction (K) last
            in_specs=[
                pl.BlockSpec((b, tk), lambda j, kk: (0, kk)),         # [x | h] K-chunk
                pl.BlockSpec((1, tn), lambda j, kk: (0, j)),          # c tile
                pl.BlockSpec((1, 4 * tn), lambda j, kk: (0, j)),      # fused bias tile
                pl.BlockSpec((tk, 4 * tn), lambda j, kk: (kk, j)),    # fused weight tile
            ],
            out_specs=pl.BlockSpec((2, b, tn), lambda j, kk: (0, 0, j)),
            scratch_shapes=[pltpu.VMEM((b, 4 * tn), jnp.float32)],
        ),
        compiler_params=pltpu.CompilerParams(
            dimension_semantics=("parallel", "arbitrary"),   # N tiles split across TCs
            vmem_limit_bytes=int(vmem_limit),
        ),
    )(lhs, c_flat, params.bias, params.w)

    c_new = out[0, :, :n].reshape(b, d1, d2)
    h_new = out[1, :, :n].reshape(b, d1, d2)
    return h_new, c_new


# -----------------------------------------------------------------------------
# Pure-JAX reference (transcription of the PyTorch forward) + test harness
# -----------------------------------------------------------------------------
def _reference(x, weight_ih, weight_hh, bias_ih, bias_hh, hidden_state=None,
               cast_dtype=None):
    """If cast_dtype is given, x / h / weights are rounded through that dtype
    (matching what the kernel feeds the MXU) while all math stays float32."""
    h1, h2 = weight_ih.shape[3], weight_ih.shape[4]
    if hidden_state is None:
        h = jnp.zeros((h1, h2), jnp.float32)
        c = jnp.zeros((h1, h2), jnp.float32)
    else:
        h, c = hidden_state
    if cast_dtype is not None and cast_dtype != jnp.float32:
        rd = lambda a: a.astype(cast_dtype).astype(jnp.float32)
        x, h = rd(x), rd(h)
        weight_ih, weight_hh = rd(weight_ih), rd(weight_hh)
    hp = jax.lax.Precision.HIGHEST
    wi = jnp.tensordot(x, weight_ih, axes=([1, 2], [1, 2]), precision=hp)
    wh = jnp.tensordot(h, weight_hh, axes=([0, 1], [1, 2]), precision=hp)
    gates = wi + bias_ih + (wh + bias_hh)
    i = jax.nn.sigmoid(gates[:, 0])
    f = jax.nn.sigmoid(gates[:, 1])
    g = jnp.tanh(gates[:, 2])
    o = jax.nn.sigmoid(gates[:, 3])
    c = f * c + i * g
    h = o * jnp.tanh(c)
    return h, c


def _run_case(seed, b, d1, d2, with_hidden, compute_dtype, atol, rtol):
    key = jax.random.PRNGKey(seed)
    kx, kw1, kw2, kb1, kb2, kh, kc = jax.random.split(key, 7)
    scale = (2.0 / (2 * d1 * d2)) ** 0.5                  # xavier-ish
    x = jax.random.normal(kx, (b, d1, d2), jnp.float32)
    weight_ih = scale * jax.random.normal(kw1, (4, d1, d2, d1, d2), jnp.float32)
    weight_hh = scale * jax.random.normal(kw2, (4, d1, d2, d1, d2), jnp.float32)
    bias_ih = 0.1 * jax.random.normal(kb1, (4, d1, d2), jnp.float32)
    bias_hh = 0.1 * jax.random.normal(kb2, (4, d1, d2), jnp.float32)
    hidden = None
    if with_hidden:
        hidden = (jax.random.normal(kh, (d1, d2), jnp.float32),
                  jax.random.normal(kc, (d1, d2), jnp.float32))

    params = prepare_multi_dim_lstm_params(
        weight_ih, weight_hh, bias_ih, bias_hh, compute_dtype=compute_dtype)
    h_out, c_out = multi_dim_lstm_cell(x, params, hidden)
    jax.block_until_ready((h_out, c_out))

    h_ref, c_ref = _reference(x, weight_ih, weight_hh, bias_ih, bias_hh, hidden,
                              cast_dtype=compute_dtype)
    assert h_out.shape == (b, d1, d2) and c_out.shape == (b, d1, d2)
    assert jnp.allclose(h_out, h_ref, atol=atol, rtol=rtol), (
        f"h mismatch (max err {float(jnp.max(jnp.abs(h_out - h_ref))):.3e})")
    assert jnp.allclose(c_out, c_ref, atol=atol, rtol=rtol), (
        f"c mismatch (max err {float(jnp.max(jnp.abs(c_out - c_ref))):.3e})")


if __name__ == "__main__":
    B = 2
    # 1) First-step path (hidden_state=None -> W_hh half skipped), bf16, 2 N-tiles.
    _run_case(0, B, 8, 32, with_hidden=False, compute_dtype=jnp.bfloat16,
              atol=3e-3, rtol=3e-3)
    # 2) Fused [x | h] path with a provided hidden state, bf16 weights.
    _run_case(0, B, 8, 32, with_hidden=True, compute_dtype=jnp.bfloat16,
              atol=3e-3, rtol=3e-3)
    # 3) Same with f32 weights (full-precision configuration of the same kernel).
    _run_case(0, B, 8, 32, with_hidden=True, compute_dtype=jnp.float32,
              atol=2e-2, rtol=2e-2)
    # 4) Larger hidden dim -> exercises the grid over N (2 tiles of 512 lanes).
    _run_case(0, B, 16, 64, with_hidden=True, compute_dtype=jnp.bfloat16,
              atol=3e-3, rtol=3e-3)
    # 5) Non-128-multiple feature size -> exercises the K/N padding + output masking.
    _run_case(0, B, 4, 20, with_hidden=True, compute_dtype=jnp.bfloat16,
              atol=3e-3, rtol=3e-3)
    print("KERNEL_OK")
</pallas_src>

<mosaic_0001>
module attributes {stable_mosaic.version = 11 : i64} {
  func.func @_lstm_gates_kernel(%arg0: i32, %arg1: i32, %arg2: memref<2x256xbf16, #tpu.memory_space<vmem>>, %arg3: memref<1x128xf32, #tpu.memory_space<vmem>>, %arg4: memref<1x512xf32, #tpu.memory_space<vmem>>, %arg5: memref<256x512xbf16, #tpu.memory_space<vmem>>, %arg6: memref<2x2x128xf32, #tpu.memory_space<vmem>>, %arg7: memref<2x512xf32, #tpu.memory_space<vmem>>) attributes {dimension_semantics = [#tpu.dimension_semantics<parallel>, #tpu.dimension_semantics<arbitrary>], iteration_bounds = array<i64: 2, 1>, scalar_prefetch = 0 : i64, scratch_operands = 1 : i64, tpu.core_type = #tpu.core_type<tc>, window_params = [{transform_indices = @transform_0, window_bounds = array<i64: 2, 256>}, {transform_indices = @transform_1, window_bounds = array<i64: 1, 128>}, {transform_indices = @transform_2, window_bounds = array<i64: 1, 512>}, {transform_indices = @transform_3, window_bounds = array<i64: 256, 512>}, {transform_indices = @transform_4, window_bounds = array<i64: 2, 2, 128>}]} {
    %c0_i32 = arith.constant 0 : i32
    %0 = arith.cmpi eq, %arg1, %c0_i32 : i32
    %1 = arith.extui %0 : i1 to i32
    %c0_i32_0 = arith.constant 0 : i32
    %2 = arith.cmpi ne, %1, %c0_i32_0 : i32
    scf.if %2 {
      %cst_10 = arith.constant 0.000000e+00 : f32
      %12 = vector.broadcast %cst_10 : f32 to vector<2x512xf32>
      %c0_11 = arith.constant 0 : index
      %c0_12 = arith.constant 0 : index
      %13 = vector.load %arg7[%c0_11, %c0_12] : memref<2x512xf32, #tpu.memory_space<vmem>>, vector<2x512xf32>
      tpu.vector_store %arg7[%c0_11, %c0_12], %12 {strides = array<i32>} : memref<2x512xf32, #tpu.memory_space<vmem>>, vector<2x512xf32>,
    } else {
    }
    %c0 = arith.constant 0 : index
    %c0_1 = arith.constant 0 : index
    %3 = vector.load %arg7[%c0, %c0_1] : memref<2x512xf32, #tpu.memory_space<vmem>>, vector<2x512xf32>
    %c0_2 = arith.constant 0 : index
    %c0_3 = arith.constant 0 : index
    %4 = vector.load %arg2[%c0_2, %c0_3] : memref<2x256xbf16, #tpu.memory_space<vmem>>, vector<2x256xbf16>
    %c0_4 = arith.constant 0 : index
    %c0_5 = arith.constant 0 : index
    %5 = vector.load %arg5[%c0_4, %c0_5] : memref<256x512xbf16, #tpu.memory_space<vmem>>, vector<256x512xbf16>
    %cst = arith.constant dense<0.000000e+00> : vector<2x512xf32>
    %6 = tpu.matmul %4, %5, %cst {dimension_numbers = #tpu.dot_dimension_numbers<[1], [0], [0], [1], [0, 0, 1, 1], [], []>} : vector<2x256xbf16>, vector<256x512xbf16>, vector<2x512xf32> -> vector<2x512xf32>
    %7 = arith.addf %3, %6 : vector<2x512xf32>
    %c0_6 = arith.constant 0 : index
    %c0_7 = arith.constant 0 : index
    %8 = vector.load %arg7[%c0_6, %c0_7] : memref<2x512xf32, #tpu.memory_space<vmem>>, vector<2x512xf32>
    tpu.vector_store %arg7[%c0_6, %c0_7], %7 {strides = array<i32>} : memref<2x512xf32, #tpu.memory_space<vmem>>, vector<2x512xf32>,
    %c0_i32_8 = arith.constant 0 : i32
    %9 = arith.cmpi eq, %arg1, %c0_i32_8 : i32
    %10 = arith.extui %9 : i1 to i32
    %c0_i32_9 = arith.constant 0 : i32
    %11 = arith.cmpi ne, %10, %c0_i32_9 : i32
    scf.if %11 {
      %c0_10 = arith.constant 0 : index
      %c0_11 = arith.constant 0 : index
      %12 = vector.load %arg7[%c0_10, %c0_11] : memref<2x512xf32, #tpu.memory_space<vmem>>, vector<2x512xf32>
      %c0_12 = arith.constant 0 : index
      %c0_13 = arith.constant 0 : index
      %13 = vector.load %arg4[%c0_12, %c0_13] : memref<1x512xf32, #tpu.memory_space<vmem>>, vector<1x512xf32>
      %14 = vector.broadcast %13 : vector<1x512xf32> to vector<2x512xf32>
      %15 = arith.addf %12, %14 : vector<2x512xf32>
      %16 = vector.extract_strided_slice %15 {offsets = [0, 0], sizes = [2, 128], strides = [1, 1]} : vector<2x512xf32> to vector<2x128xf32>
      %17 = arith.negf %16 : vector<2x128xf32>
      %18 = math.exp %17 : vector<2x128xf32>
      %cst_14 = arith.constant 1.000000e+00 : f32
      %19 = vector.broadcast %cst_14 : f32 to vector<2x128xf32>
      %20 = arith.addf %19, %18 : vector<2x128xf32>
      %21 = arith.divf %19, %20 : vector<2x128xf32>
      %22 = vector.extract_strided_slice %15 {offsets = [0, 128], sizes = [2, 128], strides = [1, 1]} : vector<2x512xf32> to vector<2x128xf32>
      %23 = arith.negf %22 : vector<2x128xf32>
      %24 = math.exp %23 : vector<2x128xf32>
      %cst_15 = arith.constant 1.000000e+00 : f32
      %25 = vector.broadcast %cst_15 : f32 to vector<2x128xf32>
      %26 = arith.addf %25, %24 : vector<2x128xf32>
      %27 = arith.divf %25, %26 : vector<2x128xf32>
      %28 = vector.extract_strided_slice %15 {offsets = [0, 256], sizes = [2, 128], strides = [1, 1]} : vector<2x512xf32> to vector<2x128xf32>
      %29 = math.tanh %28 : vector<2x128xf32>
      %30 = vector.extract_strided_slice %15 {offsets = [0, 384], sizes = [2, 128], strides = [1, 1]} : vector<2x512xf32> to vector<2x128xf32>
      %31 = arith.negf %30 : vector<2x128xf32>
      %32 = math.exp %31 : vector<2x128xf32>
      %cst_16 = arith.constant 1.000000e+00 : f32
      %33 = vector.broadcast %cst_16 : f32 to vector<2x128xf32>
      %34 = arith.addf %33, %32 : vector<2x128xf32>
      %35 = arith.divf %33, %34 : vector<2x128xf32>
      %c0_17 = arith.constant 0 : index
      %c0_18 = arith.constant 0 : index
      %36 = vector.load %arg3[%c0_17, %c0_18] : memref<1x128xf32, #tpu.memory_space<vmem>>, vector<1x128xf32>
      %37 = vector.broadcast %36 : vector<1x128xf32> to vector<2x128xf32>
      %38 = arith.mulf %27, %37 : vector<2x128xf32>
      %39 = arith.mulf %21, %29 : vector<2x128xf32>
      %40 = arith.addf %38, %39 : vector<2x128xf32>
      %c0_19 = arith.constant 0 : index
      %c0_20 = arith.constant 0 : index
      %c0_21 = arith.constant 0 : index
      %41 = vector.load %arg6[%c0_19, %c0_20, %c0_21] : memref<2x2x128xf32, #tpu.memory_space<vmem>>, vector<1x2x128xf32>
      %42 = vector.shape_cast %41 : vector<1x2x128xf32> to vector<2x128xf32>
      %43 = vector.shape_cast %40 : vector<2x128xf32> to vector<1x2x128xf32>
      tpu.vector_store %arg6[%c0_19, %c0_20, %c0_21], %43 {strides = array<i32>} : memref<2x2x128xf32, #tpu.memory_space<vmem>>, vector<1x2x128xf32>,
      %44 = math.tanh %40 : vector<2x128xf32>
      %45 = arith.mulf %35, %44 : vector<2x128xf32>
      %c1 = arith.constant 1 : index
      %c0_22 = arith.constant 0 : index
      %c0_23 = arith.constant 0 : index
      %46 = vector.load %arg6[%c1, %c0_22, %c0_23] : memref<2x2x128xf32, #tpu.memory_space<vmem>>, vector<1x2x128xf32>
      %47 = vector.shape_cast %46 : vector<1x2x128xf32> to vector<2x128xf32>
      %48 = vector.shape_cast %45 : vector<2x128xf32> to vector<1x2x128xf32>
      tpu.vector_store %arg6[%c1, %c0_22, %c0_23], %48 {strides = array<i32>} : memref<2x2x128xf32, #tpu.memory_space<vmem>>, vector<1x2x128xf32>,
    } else {
    }
    return
  }
  func.func @transform_0(%arg0: i32, %arg1: i32) -> (i32, i32) {
    %c0_i32 = arith.constant 0 : i32
    %c0_i32_0 = arith.constant 0 : i32
    return %c0_i32, %arg1 : i32, i32
  }
  func.func @transform_1(%arg0: i32, %arg1: i32) -> (i32, i32) {
    %c0_i32 = arith.constant 0 : i32
    %c0_i32_0 = arith.constant 0 : i32
    return %c0_i32, %arg0 : i32, i32
  }
  func.func @transform_2(%arg0: i32, %arg1: i32) -> (i32, i32) {
    %c0_i32 = arith.constant 0 : i32
    %c0_i32_0 = arith.constant 0 : i32
    return %c0_i32, %arg0 : i32, i32
  }
  func.func @transform_3(%arg0: i32, %arg1: i32) -> (i32, i32) {
    %c0_i32 = arith.constant 0 : i32
    return %arg1, %arg0 : i32, i32
  }
  func.func @transform_4(%arg0: i32, %arg1: i32) -> (i32, i32, i32) {
    %c0_i32 = arith.constant 0 : i32
    %c0_i32_0 = arith.constant 0 : i32
    %c0_i32_1 = arith.constant 0 : i32
    return %c0_i32, %c0_i32_0, %arg0 : i32, i32, i32
  }
}

</mosaic_0001>

<bundles_post_ra>
// kernel: tpu_custom_call.1
= control target key start
LH: loop header
LB: loop body
LE: loop exit
PB: predicated region body
PF: predicated region fallthrough
CT: control target
= control target key end

     0   :  { %s1897_s0 = inlined_call_operand.hbm [shape: bf16[2,256], index: 0, kind: input, shape index: {}]   ;;  %s1898_s1 = inlined_call_operand.vmem [shape: f32[1,256], index: 1, kind: input, shape index: {}]   ;;  %s1899_s2 = inlined_call_operand.hbm [shape: f32[1,1024], index: 2, kind: input, shape index: {}]   ;;  %s1900_s3 = inlined_call_operand.hbm [shape: bf16[512,1024], index: 3, kind: input, shape index: {}]   ;;  %s1901_s4 = inlined_call_operand.hbm [shape: f32[2,2,256], index: 4, kind: output, shape index: {}]  }
   0x1   :  { %1907 = sst [smem:[#allocation14_spill]] %s1899_s2 }
   0x2   :  { %1908 = sst [smem:[#allocation15_spill]] %s1900_s3 }
   0x3   :  { %9 = vsyncpa [#allocation4], 0 }
   0x4   :  { %10 = vsyncpa [#allocation7], 0 }
   0x5   :  { %12 = vsyncpa [#allocation7 + $0x1], 0 }
   0x6   :  { %13 = vsyncpa [#allocation5], 0 }
   0x7   :  { %15 = vsyncpa [#allocation5 + $0x1], 0  ;;  %s1554_s15 = smov 0   ;;  %s1556_s16 = smov 0  }
   0x8   :  { %s1558_s17 = smov 0   ;;  %s1560_s18 = smov 0  }
   0x9   :  { %s1562_s19 = smov 0   ;;  %s1564_s20 = smov 0  }
   0xa LB: > { %s33_s21 = sadd.s32 1, %s1511_s19  ;;  %s92_s22 = sadd.s32 1, %s1503_s17  ;;  %s1515_s20 = sphi %s1564_s20, %s21_s20   ;;  %s1511_s19 = sphi %s1562_s19, %s1930_s19   ;;  %s1507_s18 = sphi %s1560_s18, %s1929_s18   ;;  %s1503_s17 = sphi %s1558_s17, %s1928_s17   ;;  %s1499_s16 = sphi %s1556_s16, %s1927_s16   ;;  %s1495_s15 = sphi %s1554_s15, %s1926_s15  }
   0xb   : > { %p35_p0 = scmp.ge.s32.totalorder %s33_s21, 2  ;;  %p99_p1 = scmp.ne.s32.totalorder %s1503_s17, %s1499_s16 }
   0xc   : > { %p100_p2 = scmp.eq.s32.totalorder %s1515_s20, 0  ;;  %p1169_p5 = scmp.lt.s32.totalorder %s1515_s20, 2 }
   0xd   : > { %s1932_s21 = smov (%p35_p0, %s33_s21), 0  ;;  %s203_s24 = sand.u32 1, %s1515_s20  }
   0xe   : > { %1909 = sst [smem:[#allocation13_spill]] %s1932_s21  ;;  %p101_p4 = por %p100_p2, %p99_p1 }
   0xf   : > { %s89_s23 = ssub.s32 %s1511_s19, %s1932_s21  ;;  %s205_s25 = sand.u32 1, %s1503_s17  }
  0x10   : > { %p90_p6 = scmp.eq.s32.totalorder %s89_s23, 0  ;;  %s1141_s26 = sshll.u32 %s1511_s19, 6 }
  0x11   : > { %s1056_s28 = sshll.u32 %s205_s25, 2  ;;  %s1910_s2 = sld [smem:[#allocation14_spill]] }
  0x12   : > { %s1602_s27 = scalar_select %p90_p6, %s1503_s17, %s92_s22  }
  0x13   : > { %p1609_p7 = pnand %p1169_p5, %p101_p4  ;;  %s207_s7 = scalar_lea.vmem [#allocation6], %s1056_s28 }
  0x14   : > { %s215_s8 = sshll.u32 %s207_s7, 4  ;;  %s1613_s9 = sshll.u32 %s205_s25, 9  ;;  %s1615_s8 = int_to_ptr.vmem [resolvable:$true] %s215_s8 }
  0x15   : > { %s1617_s10 = scalar_lea.sflag [#allocation7], %s203_s24  ;;  %p1343_p9 = pneg %p1609_p7 }
  0x17   : > { %s1607_s5 = scalar_lea.hbm %s1910_s2, %s1141_s26  ;;  %s1346_s14 = scalar_lea.hbm %s1910_s2, 128 }
  0x18   : > { %s1341_s11 = scalar_lea.hbm %s1607_s5, 64  ;;  %p1347_p12 = scmp.lt.u32.totalorder %s1607_s5, %s1910_s2 }
  0x19   : > { %p1342_p8 = scmp.ne.s32.totalorder %s1607_s5, %s1341_s11  ;;  %p1348_p13 = scmp.lt.u32.totalorder %s1346_s14, %s1341_s11 }
  0x1a   : > { %p1350_p2 = scmp.lt.u32.totalorder %s1341_s11, %s1607_s5 }
  0x1b   : > { %p1344_p10 = pnand %p1343_p9, %p1342_p8  ;;  %p1349_p0 = por %p1348_p13, %p1347_p12 }
  0x1d   : > { %p1345_p11 = pneg %p1344_p10  ;;  %p1351_p4 = por %p1350_p2, %p1349_p0 }
  0x1f   : > { %p1352_p5 = pnand %p1351_p4, %p1345_p11 }
  0x21   : > { %1355 = shalt.err (!%p1352_p5)
}
  0x22   : > { %s1356_s24 = scalar_lea.vmem %s1615_s8, 64  ;;  %s1517_s25 = smov [#allocation6]  }
  0x23   : > { %p1357_p6 = scmp.ne.s32.totalorder %s1615_s8, %s1356_s24  ;;  %s1361_s26 = sshll.u32 %s1517_s25, 4  ;;  %s1362_s26 = int_to_ptr.vmem [resolvable:$false] %s1361_s26 }
  0x24   : > { %s1363_s28 = scalar_lea.vmem %s1362_s26, 128  ;;  %p1364_p3 = scmp.lt.s32.totalorder %s1615_s8, %s1362_s26 }
  0x25   : > { %p1359_p8 = pnand %p1357_p6, %p1343_p9  ;;  %p1365_p12 = scmp.lt.s32.totalorder %s1363_s28, %s1356_s24 }
  0x27   : > { %p1360_p10 = pneg %p1359_p8  ;;  %p1366_p13 = por %p1365_p12, %p1364_p3 }
  0x29   : > { %p1367_p0 = pnand %p1366_p13, %p1360_p10 }
  0x2b   : > { %1370 = shalt.err (!%p1367_p0)
}
  0x2c   : > { %1160 = dma.hbm_to_vmem [thread:$0]  (!%p1609_p7), %s1607_s5, 64, %s1615_s8, %s1617_s10  }
  0x2d   : > { %s1142_s29 = sshll.u32 %s1511_s19, 8  ;;  %s1912_s3 = sld [smem:[#allocation15_spill]] }
  0x2e   : > { %s226_s12 = scalar_lea.vmem [#allocation8], %s1613_s9  ;;  %s1653_s14 = sadd.s32 4294967295, %s1515_s20  }
  0x2f   : > { %s236_s13 = sshll.u32 %s226_s12, 4  ;;  %s1052_s22 = sadd.s32 4294967294, %s1515_s20   ;;  %s1679_s13 = int_to_ptr.vmem [resolvable:$true] %s236_s13 }
  0x30   : > { %p105_p3 = scmp.ne.s32.totalorder %s1499_s16, %s1495_s15  ;;  %p1902_p11 = scmp.eq.s32.totalorder %s1653_s14, 0 }
  0x31   : > { %p157_p2 = scmp.eq.s32.totalorder %s1653_s14, 1  ;;  %p163_p4 = scmp.eq.s32.totalorder %s1052_s22, 1 }
  0x32   : > { %p1053_p5 = scmp.ge.s32.totalorder %s1515_s20, 1  ;;  %p1663_p6 = por %p1902_p11, %p105_p3 }
  0x33   : > { %s1649_s11 = scalar_lea.hbm %s1912_s3, %s1142_s29  ;;  %p1670_p8 = por %p157_p2, %p99_p1 }
  0x34   : > { %s1913_s5 = scalar_select %p1663_p6, 1, 0 }
  0x35   : > { %s1914_s8 = scalar_select %p1670_p8, 1, 0 }
  0x36   : > { %p1674_p10 = por %p163_p4, %p105_p3  ;;  %p170_p12 = scmp.lt.s32.totalorder %s1515_s20, 3 }
  0x37   : > { %s1518_s24 = smov [#allocation3]   ;;  %s1371_s28 = scalar_lea.hbm %s1649_s11, 8192 }
  0x38   : > { %s1915_s9 = scalar_select %p1674_p10, 1, 0 }
  0x39   : > { %p1681_p13 = pnand %p1053_p5, %p170_p12  ;;  %s186_s25 = sshll.u32 %s1518_s24, 4  ;;  %s1687_s25 = int_to_ptr.vmem [resolvable:$true] %s186_s25 }
  0x3a   : > { %p1372_p3 = scmp.ne.s32.totalorder %s1649_s11, %s1371_s28  ;;  %s1376_s7 = scalar_lea.hbm %s1912_s3, 32768 }
  0x3b   : > { %s1916_s23 = scalar_select %p1681_p13, 1, 0 }
  0x3c   : > { %p1153_p1 = pneg %p1681_p13  ;;  %p1374_p2 = pnand %p1372_p3, %p1343_p9 }
  0x3d   : > { %p1377_p5 = scmp.lt.u32.totalorder %s1649_s11, %s1912_s3  ;;  %p1378_p12 = scmp.lt.u32.totalorder %s1376_s7, %s1371_s28 }
  0x3e   : > { %p1691_p0 = pnand %p1153_p1, %p1902_p11  ;;  %p1375_p4 = pneg %p1374_p2 }
  0x3f   : > { %p1379_p10 = por %p1378_p12, %p1377_p5  ;;  %p1380_p1 = scmp.lt.u32.totalorder %s1371_s28, %s1649_s11 }
  0x41   : > { %p1381_p11 = por %p1380_p1, %p1379_p10 }
  0x43   : > { %p1382_p8 = pnand %p1381_p11, %p1375_p4 }
  0x45   : > { %1385 = shalt.err (!%p1382_p8)
}
  0x46   : > { %s1386_s24 = scalar_lea.vmem %s1679_s13, 8192  ;;  %s1519_s29 = smov [#allocation8]  }
  0x47   : > { %p1387_p3 = scmp.ne.s32.totalorder %s1679_s13, %s1386_s24  ;;  %s1391_s30 = sshll.u32 %s1519_s29, 4  ;;  %s1392_s30 = int_to_ptr.vmem [resolvable:$false] %s1391_s30 }
  0x48   : > { %s1393_s12 = scalar_lea.vmem %s1392_s30, 16384  ;;  %p1394_p13 = scmp.lt.s32.totalorder %s1679_s13, %s1392_s30 }
  0x49   : > { %p1389_p2 = pnand %p1387_p3, %p1343_p9  ;;  %p1395_p5 = scmp.lt.s32.totalorder %s1393_s12, %s1386_s24 }
  0x4b   : > { %p1390_p6 = pneg %p1389_p2  ;;  %p1396_p12 = por %p1395_p5, %p1394_p13 }
  0x4d   : > { %p1397_p10 = pnand %p1396_p12, %p1390_p6 }
  0x4f   : > { %1400 = shalt.err (!%p1397_p10)
}
  0x50   : > { %s1520_s28 = smov 512   ;;  %s1521_s7 = smov 256  }
  0x51   : > { %s1522_s22 = smov 16   ;;  %s1401_s29 = scalar_lea.hbm %s1897_s0, 32 }
  0x52   : > { %1163 = dma.hbm_to_vmem [thread:$0]  (!%p1609_p7), %s1649_s11, 8192, %s1679_s13, %s1617_s10, %s1520_s28, %s1521_s7, %s1522_s22  }
  0x53   : > { %p1402_p9 = scmp.ne.s32.totalorder %s1897_s0, %s1401_s29  ;;  %p1403_p11 = pneg %p1691_p0 }
  0x54   : > { %p1408_p13 = scmp.lt.u32.totalorder %s1401_s29, %s1897_s0 }
  0x55   : > { %p1404_p6 = pnand %p1403_p11, %p1402_p9 }
  0x57   : > { %p1405_p8 = pneg %p1404_p6 }
  0x59   : > { %p1410_p4 = pnand %p1408_p13, %p1405_p8 }
  0x5b   : > { %1413 = shalt.err (!%p1410_p4)
}
  0x5c   : > { %s1414_s6 = scalar_lea.vmem %s1687_s25, 32  ;;  %p1422_p2 = scmp.lt.s32.totalorder %s1687_s25, %s1687_s25 }
  0x5d   : > { %p1415_p7 = scmp.ne.s32.totalorder %s1687_s25, %s1414_s6  ;;  %p1423_p5 = scmp.lt.s32.totalorder %s1414_s6, %s1414_s6 }
  0x5f   : > { %p1417_p1 = pnand %p1415_p7, %p1403_p11  ;;  %p1424_p12 = por %p1423_p5, %p1422_p2 }
  0x61   : > { %p1418_p3 = pneg %p1417_p1 }
  0x63   : > { %p1425_p10 = pnand %p1424_p12, %p1418_p3 }
  0x65   : > { %1428 = shalt.err (!%p1425_p10)
}
  0x66   : > { %1156 = dma.hbm_to_vmem [thread:$0]  (!%p1691_p0), %s1897_s0, 32, %s1687_s25, [#allocation4]  }
  0x67   : > { %p1918_p9 = scmp.ne.s32.totalorder %s1916_s23, 0 }
  0x68   : > { %p1919_p6 = scmp.eq.s32.totalorder (!%p1918_p9), %s1653_s14, 0 }
  0x69   : > { %248 = sbr.rel (%p1918_p9) target bundleno = 467 (0x1d3), region = 36 }
  0x70   : > { %1482 = dma.done.wait (%p1919_p6), [#allocation4], 32   ;;  %p1920_p11 = pmov %p1919_p6 }
  0x71   : > { %s254_s21 = sand.u32 1, %s1653_s14   ;;  %s1748_s10 = sand.u32 1, %s1499_s16  }
  0x72   : > { %1484 = vsyncadd (%p1920_p11), [#allocation4], 4294967264  ;;  %s1064_s11 = sshll.u32 %s1748_s10, 2  ;;  %s255_s13 = scalar_lea.sflag [#allocation7], %s254_s21 }
  0x73   : > { %s1753_s25 = scalar_lea.vmem [#allocation6], %s1064_s11  ;;  %p1921_p0 = scmp.ne.s32.totalorder %s1913_s5, 0 }
  0x75   : > { %1486 = dma.done.wait (%p1921_p0), %s255_s13, 8256  }
  0x76   : > { %1488 = vsyncadd (%p1921_p0), %s255_s13, 4294959040  ;;  %s1065_s23 = sshll.u32 %s1748_s10, 9  ;;  %v1523_v38 = vmov 1966171168   ;;  %v390_v40 = vlaneseq  ;;  %p301_p8 = scmp.lt.s32.totalorder %s1507_s18, 1 }
  0x77   : > { %s1760_s26 = scalar_lea.vmem [#allocation8], %s1065_s23  ;;  %v388_v39 = vunpack.c.l.s4 %v1523_v38  ;;  %v1067_v52 = vld.sshfl [vmem:[#allocation3] sm:$0x11 pattern:$0x75316420]  ;;  %s299_s22 = scalar_lea.vmem [#allocation9], %s1064_s11 }
  0x78   : > { %v1229_v0 = vld [vmem:[%s1760_s26 + $0x4] ss:$16 sps:$4 sm:$0xff]   ;;  %v1231_v1 = vld [vmem:[%s1760_s26 + $0xc] ss:$16 sps:$4 sm:$0xff]   ;;  %v1233_v2 = vld [vmem:[%s1760_s26] ss:$16 sps:$4 sm:$0xff]   ;;  %v386_v55 = vcombine.high %v1067_v52, %v1067_v52 }
  0x79   : > { %723 = vmatprep.subr.bf16.mxu0 %v1229_v0  ;;  %v1234_v3 = vld [vmem:[%s1760_s26 + $0x8] ss:$16 sps:$4 sm:$0xff]   ;;  %764 = vmatprep.subr.bf16.mxu1 %v1231_v1  ;;  %v1235_v4 = vld [vmem:[%s1760_s26 + $0x24] ss:$16 sps:$4 sm:$0xff]   ;;  %v1237_v5 = vld [vmem:[%s1760_s26 + $0x2c] ss:$16 sps:$4 sm:$0xff]   ;;  %v389_v45 = vunpack.c.0.s8 %v388_v39 }
  0x7a   : > { %724 = vmatpush1.bf16.msra.mxu0 %v1233_v2  ;;  %765 = vmatpush1.bf16.msra.mxu1 %v1234_v3  ;;  %v1239_v6 = vld [vmem:[%s1760_s26 + $0x20] ss:$16 sps:$4 sm:$0xff]   ;;  %v1240_v7 = vld [vmem:[%s1760_s26 + $0x28] ss:$16 sps:$4 sm:$0xff]   ;;  %v1241_v8 = vld [vmem:[%s1760_s26 + $0x44] ss:$16 sps:$4 sm:$0xff]  }
  0x7b   : > { %725 = vmatprep.subr.bf16.mxu0 %v1235_v4  ;;  %766 = vmatprep.subr.bf16.mxu1 %v1237_v5  ;;  %v1243_v9 = vld [vmem:[%s1760_s26 + $0x4c] ss:$16 sps:$4 sm:$0xff]   ;;  %v1245_v10 = vld [vmem:[%s1760_s26 + $0x40] ss:$16 sps:$4 sm:$0xff]   ;;  %v1246_v11 = vld [vmem:[%s1760_s26 + $0x48] ss:$16 sps:$4 sm:$0xff]  }
  0x7c   : > { %v1247_v12 = vld [vmem:[%s1760_s26 + $0x64] ss:$16 sps:$4 sm:$0xff]   ;;  %v1249_v13 = vld [vmem:[%s1760_s26 + $0x6c] ss:$16 sps:$4 sm:$0xff]   ;;  %v1251_v14 = vld [vmem:[%s1760_s26 + $0x60] ss:$16 sps:$4 sm:$0xff]  }
  0x7d   : > { %v1252_v15 = vld [vmem:[%s1760_s26 + $0x68] ss:$16 sps:$4 sm:$0xff]   ;;  %v1253_v16 = vld [vmem:[%s1760_s26 + $0x84] ss:$16 sps:$4 sm:$0xff]   ;;  %v1255_v17 = vld [vmem:[%s1760_s26 + $0x8c] ss:$16 sps:$4 sm:$0xff]  }
  0x7e   : > { %726 = vmatpush1.bf16.msra.mxu0 %v1239_v6  ;;  %767 = vmatpush1.bf16.msra.mxu1 %v1240_v7  ;;  %v1257_v18 = vld [vmem:[%s1760_s26 + $0x80] ss:$16 sps:$4 sm:$0xff]   ;;  %v1258_v19 = vld [vmem:[%s1760_s26 + $0x88] ss:$16 sps:$4 sm:$0xff]   ;;  %v1259_v20 = vld [vmem:[%s1760_s26 + $0xa4] ss:$16 sps:$4 sm:$0xff]  }
  0x7f   : > { %727 = vmatprep.subr.bf16.mxu0 %v1241_v8  ;;  %768 = vmatprep.subr.bf16.mxu1 %v1243_v9  ;;  %v1261_v21 = vld [vmem:[%s1760_s26 + $0xac] ss:$16 sps:$4 sm:$0xff]   ;;  %v1263_v22 = vld [vmem:[%s1760_s26 + $0xa0] ss:$16 sps:$4 sm:$0xff]   ;;  %v1264_v23 = vld [vmem:[%s1760_s26 + $0xa8] ss:$16 sps:$4 sm:$0xff]  }
  0x80   : > { %v1265_v24 = vld [vmem:[%s1760_s26 + $0xc4] ss:$16 sps:$4 sm:$0xff]   ;;  %v1267_v25 = vld [vmem:[%s1760_s26 + $0xcc] ss:$16 sps:$4 sm:$0xff]   ;;  %v1269_v26 = vld [vmem:[%s1760_s26 + $0xc0] ss:$16 sps:$4 sm:$0xff]  }
  0x81   : > { %v1270_v27 = vld [vmem:[%s1760_s26 + $0xc8] ss:$16 sps:$4 sm:$0xff]   ;;  %v1271_v28 = vld [vmem:[%s1760_s26 + $0xe4] ss:$16 sps:$4 sm:$0xff]   ;;  %v1273_v29 = vld [vmem:[%s1760_s26 + $0xec] ss:$16 sps:$4 sm:$0xff]  }
  0x82   : > { %728 = vmatpush1.bf16.msra.mxu0 %v1245_v10  ;;  %769 = vmatpush1.bf16.msra.mxu1 %v1246_v11  ;;  %v1275_v30 = vld [vmem:[%s1760_s26 + $0xe0] ss:$16 sps:$4 sm:$0xff]   ;;  %v1276_v31 = vld [vmem:[%s1760_s26 + $0xe8] ss:$16 sps:$4 sm:$0xff]   ;;  %v1277_v32 = vld [vmem:[%s1760_s26 + $0x104] ss:$16 sps:$4 sm:$0xff]  }
  0x83   : > { %729 = vmatprep.subr.bf16.mxu0 %v1247_v12  ;;  %770 = vmatprep.subr.bf16.mxu1 %v1249_v13  ;;  %v1279_v33 = vld [vmem:[%s1760_s26 + $0x10c] ss:$16 sps:$4 sm:$0xff]   ;;  %v1281_v34 = vld [vmem:[%s1760_s26 + $0x100] ss:$16 sps:$4 sm:$0xff]   ;;  %v1282_v35 = vld [vmem:[%s1760_s26 + $0x108] ss:$16 sps:$4 sm:$0xff]  }
  0x84   : > { %v1283_v36 = vld [vmem:[%s1760_s26 + $0x124] ss:$16 sps:$4 sm:$0xff]   ;;  %v1285_v37 = vld [vmem:[%s1760_s26 + $0x12c] ss:$16 sps:$4 sm:$0xff]   ;;  %v1287_v41 = vld [vmem:[%s1760_s26 + $0x120] ss:$16 sps:$4 sm:$0xff]  }
  0x85   : > { %v1288_v42 = vld [vmem:[%s1760_s26 + $0x128] ss:$16 sps:$4 sm:$0xff]   ;;  %v1289_v43 = vld [vmem:[%s1760_s26 + $0x144] ss:$16 sps:$4 sm:$0xff]   ;;  %v1291_v44 = vld [vmem:[%s1760_s26 + $0x14c] ss:$16 sps:$4 sm:$0xff]  }
  0x86   : > { %730 = vmatpush1.bf16.msra.mxu0 %v1251_v14  ;;  %771 = vmatpush1.bf16.msra.mxu1 %v1252_v15  ;;  %v1804_v46 = vshrl.u32 %v390_v40, 7  ;;  %v1293_v47 = vld [vmem:[%s1760_s26 + $0x140] ss:$16 sps:$4 sm:$0xff]   ;;  %v1294_v48 = vld [vmem:[%s1760_s26 + $0x148] ss:$16 sps:$4 sm:$0xff]   ;;  %s302_s14 = scalar_select %p301_p8, %s1507_s18, 1 }
  0x87   : > { %731 = vmatprep.subr.bf16.mxu0 %v1253_v16  ;;  %772 = vmatprep.subr.bf16.mxu1 %v1255_v17  ;;  %v1295_v49 = vld [vmem:[%s1760_s26 + $0x164] ss:$16 sps:$4 sm:$0xff]   ;;  %v1297_v50 = vld [vmem:[%s1760_s26 + $0x16c] ss:$16 sps:$4 sm:$0xff]   ;;  %v1299_v53 = vld [vmem:[%s1760_s26 + $0x160] ss:$16 sps:$4 sm:$0xff]  }
  0x88   : > { %v392_v51 = vsub.s32 %v389_v45, %v1804_v46  ;;  %v1300_v54 = vld [vmem:[%s1760_s26 + $0x168] ss:$16 sps:$4 sm:$0xff]   ;;  %v1301_v56 = vld [vmem:[%s1760_s26 + $0x184] ss:$16 sps:$4 sm:$0xff]   ;;  %v1303_v57 = vld [vmem:[%s1760_s26 + $0x18c] ss:$16 sps:$4 sm:$0xff]   ;;  %s303_s7 = scalar_lea.vmem %s1898_s1, %s302_s14 }
  0x89   : > { %v1305_v59 = vld [vmem:[%s1760_s26 + $0x180] ss:$16 sps:$4 sm:$0xff]   ;;  %v1306_v60 = vld [vmem:[%s1760_s26 + $0x188] ss:$16 sps:$4 sm:$0xff]   ;;  %v1307_v61 = vld [vmem:[%s1760_s26 + $0x1a4] ss:$16 sps:$4 sm:$0xff]  }
  0x8a   : > { %732 = vmatpush1.bf16.msra.mxu0 %v1257_v18  ;;  %773 = vmatpush1.bf16.msra.mxu1 %v1258_v19  ;;  %v400_v58 = vrot.slane %v386_v55, %v392_v51  ;;  %v1309_v62 = vld [vmem:[%s1760_s26 + $0x1ac] ss:$16 sps:$4 sm:$0xff]   ;;  %v1311_v63 = vld [vmem:[%s1760_s26 + $0x1a0] ss:$16 sps:$4 sm:$0xff]   ;;  %v1312_v0 = vld [vmem:[%s1760_s26 + $0x1a8] ss:$16 sps:$4 sm:$0xff]   ;;  %v393_v9 = vrot.slane %v1067_v52, %v392_v51 }
  0x8b   : > { %733 = vmatprep.subr.bf16.mxu0 %v1259_v20  ;;  %774 = vmatprep.subr.bf16.mxu1 %v1261_v21  ;;  %v1313_v1 = vld [vmem:[%s1760_s26 + $0x1c4] ss:$16 sps:$4 sm:$0xff]   ;;  %v1315_v2 = vld [vmem:[%s1760_s26 + $0x1cc] ss:$16 sps:$4 sm:$0xff]   ;;  %v1317_v3 = vld [vmem:[%s1760_s26 + $0x1c0] ss:$16 sps:$4 sm:$0xff]  }
  0x8c   : > { %755 = vmatprep.mubr.bf16.mxu0 %v400_v58  ;;  %796 = vmatprep.mubr.bf16.mxu1 %v400_v58  ;;  %v1318_v4 = vld [vmem:[%s1760_s26 + $0x1c8] ss:$16 sps:$4 sm:$0xff]   ;;  %v1319_v5 = vld [vmem:[%s1760_s26 + $0x1e4] ss:$16 sps:$4 sm:$0xff]   ;;  %v1321_v6 = vld [vmem:[%s1760_s26 + $0x1ec] ss:$16 sps:$4 sm:$0xff]  }
  0x8d   : > { %v1323_v7 = vld [vmem:[%s1760_s26 + $0x1e0] ss:$16 sps:$4 sm:$0xff]   ;;  %v1324_v8 = vld [vmem:[%s1760_s26 + $0x1e8] ss:$16 sps:$4 sm:$0xff]   ;;  %v1524_v10 = vmov 1983009808  }
  0x8e   : > { %734 = vmatpush1.bf16.msra.mxu0 %v1263_v22  ;;  %775 = vmatpush1.bf16.msra.mxu1 %v1264_v23  ;;  %v812_v11 = vunpack.c.l.s4 %v1524_v10  ;;  %v837_v12 = vsub.s32 0, %v1804_v46  ;;  %v841_v13 = vsub.s32 1, %v1804_v46  ;;  %v845_v14 = vsub.s32 2, %v1804_v46  ;;  %v833_v16 = vld [vmem:[%s1753_s25] sm:$0xf]  ;;  %s1138_s29 = sshll.u32 %s1507_s18, 5 }
  0x8f   : > { %735 = vmatprep.subr.bf16.mxu0 %v1265_v24  ;;  %776 = vmatprep.subr.bf16.mxu1 %v1267_v25  ;;  %v849_v15 = vsub.s32 3, %v1804_v46  ;;  %s924_s30 = sshll.u32 %s299_s22, 4  ;;  %s1846_s6 = scalar_lea.hbm %s1901_s4, %s1138_s29  ;;  %s1848_s30 = int_to_ptr.vmem [resolvable:$true] %s924_s30 }
  0x90   : > { %v813_v17 = vunpack.c.0.s8 %v812_v11  ;;  %v838_v18 = vrot.slane %v833_v16, %v837_v12  ;;  %v842_v19 = vrot.slane %v833_v16, %v841_v13  ;;  %v846_v20 = vrot.slane %v833_v16, %v845_v14  ;;  %s912_s2 = scalar_lea.sflag [#allocation5], %s1748_s10  ;;  %s1429_s3 = scalar_lea.vmem %s1848_s30, 64 }
  0x91   : > { %v850_v21 = vrot.slane %v833_v16, %v849_v15  ;;  %p1430_p13 = scmp.ne.s32.totalorder %s1848_s30, %s1429_s3  ;;  %p1922_p4 = scmp.ne.s32.totalorder %s1914_s8, 0 }
  0x92   : > { %736 = vmatpush1.bf16.msra.mxu0 %v1269_v26  ;;  %777 = vmatpush1.bf16.msra.mxu1 %v1270_v27  ;;  %v816_v22 = vsub.s32 %v813_v17, %v1804_v46  ;;  %v851_v23 = vcombine.low %v838_v18, %v842_v19  ;;  %s1525_s18 = smov [#allocation9]  }
  0x93   : > { %737 = vmatprep.subr.bf16.mxu0 %v1271_v28  ;;  %778 = vmatprep.subr.bf16.mxu1 %v1273_v29  ;;  %v852_v24 = vcombine.low %v846_v20, %v850_v21  ;;  %p1431_p7 = pnand %p1430_p13, %p1922_p4  ;;  %s1433_s21 = sshll.u32 %s1525_s18, 4  ;;  %s1434_s21 = int_to_ptr.vmem [resolvable:$false] %s1433_s21 }
  0x94   : > { %v859_v27 = vrot.slane %v851_v23, %v816_v22  ;;  %s1435_s11 = scalar_lea.vmem %s1434_s21, 128  ;;  %p1436_p3 = scmp.lt.s32.totalorder %s1848_s30, %s1434_s21 }
  0x95   : > { %v866_v28 = vrot.slane %v852_v24, %v816_v22  ;;  %p1432_p1 = pneg %p1431_p7  ;;  %p1437_p2 = scmp.lt.s32.totalorder %s1435_s11, %s1429_s3 }
  0x96   : > { %738 = vmatpush1.bf16.msra.mxu0 %v1275_v30  ;;  %779 = vmatpush1.bf16.msra.mxu1 %v1276_v31 }
  0x97   : > { %739 = vmatprep.subr.bf16.mxu0 %v1277_v32  ;;  %780 = vmatprep.subr.bf16.mxu1 %v1279_v33  ;;  %v867_v39 = vcombine.low %v859_v27, %v866_v28  ;;  %p1438_p5 = por %p1437_p2, %p1436_p3 }
  0x99   : > { %p1439_p12 = pnand %p1438_p5, %p1432_p1 }
  0x9a   : > { %740 = vmatpush1.bf16.msra.mxu0 %v1281_v34  ;;  %781 = vmatpush1.bf16.msra.mxu1 %v1282_v35 }
  0x9b   : > { %741 = vmatprep.subr.bf16.mxu0 %v1283_v36  ;;  %782 = vmatprep.subr.bf16.mxu1 %v1285_v37 }
  0x9e   : > { %742 = vmatpush1.bf16.msra.mxu0 %v1287_v41  ;;  %783 = vmatpush1.bf16.msra.mxu1 %v1288_v42 }
  0x9f   : > { %743 = vmatprep.subr.bf16.mxu0 %v1289_v43  ;;  %784 = vmatprep.subr.bf16.mxu1 %v1291_v44 }
  0xa2   : > { %744 = vmatpush1.bf16.msra.mxu0 %v1293_v47  ;;  %785 = vmatpush1.bf16.msra.mxu1 %v1294_v48 }
  0xa3   : > { %745 = vmatprep.subr.bf16.mxu0 %v1295_v49  ;;  %786 = vmatprep.subr.bf16.mxu1 %v1297_v50 }
  0xa6   : > { %746 = vmatpush1.bf16.msra.mxu0 %v1299_v53  ;;  %787 = vmatpush1.bf16.msra.mxu1 %v1300_v54  ;;  %v1135_v54 = vld [vmem:[%s303_s7] ss:$0 sm:$0xff] }
  0xa7   : > { %747 = vmatprep.subr.bf16.mxu0 %v1301_v56  ;;  %788 = vmatprep.subr.bf16.mxu1 %v1303_v57 }
  0xaa   : > { %748 = vmatpush1.bf16.msra.mxu0 %v1305_v59  ;;  %789 = vmatpush1.bf16.msra.mxu1 %v1306_v60 }
  0xab   : > { %749 = vmatprep.subr.bf16.mxu0 %v1307_v61  ;;  %790 = vmatprep.subr.bf16.mxu1 %v1309_v62 }
  0xae   : > { %750 = vmatpush1.bf16.msra.mxu0 %v1311_v63  ;;  %791 = vmatpush1.bf16.msra.mxu1 %v1312_v0 }
  0xaf   : > { %751 = vmatprep.subr.bf16.mxu0 %v1313_v1  ;;  %792 = vmatprep.subr.bf16.mxu1 %v1315_v2 }
  0xb2   : > { %752 = vmatpush1.bf16.msra.mxu0 %v1317_v3  ;;  %793 = vmatpush1.bf16.msra.mxu1 %v1318_v4 }
  0xb3   : > { %753 = vmatprep.subr.bf16.mxu0 %v1319_v5  ;;  %794 = vmatprep.subr.bf16.mxu1 %v1321_v6 }
  0xb6   : > { %754 = vmatpush1.bf16.msra.mxu0 %v1323_v7  ;;  %795 = vmatpush1.bf16.msra.mxu1 %v1324_v8 }
  0xb9   : > { %756 = vmatmul.mubr.bf16.vlgmr.msra.gmra.mrb[0].mxu0 %v393_v9  ;;  %797 = vmatmul.mubr.bf16.vlgmr.msra.gmra.mrb[0].mxu1 %v393_v9 }
 0x18c   : > { %v757_v25 = vpop.f32.mrb[0].mxu0  ;;  %v798_v26 = vpop.f32.mrb[0].mxu1 }
 0x18d   : > { %v759_v29 = vpop.f32.mrb[1].mxu0  ;;  %v800_v30 = vpop.f32.mrb[1].mxu1 }
 0x18e   : > { %v809_v31 = vcombine.low %v757_v25, %v759_v29  ;;  %v810_v32 = vcombine.low %v798_v26, %v800_v30  ;;  %v761_v33 = vpop.f32.mrb[2].mxu0  ;;  %v802_v34 = vpop.f32.mrb[2].mxu1 }
 0x18f   : > { %v762_v35 = vpop.f32.mrb[3].mxu0  ;;  %v803_v36 = vpop.f32.mrb[3].mxu1 }
 0x190   : > { %v817_v37 = vrot.slane %v809_v31, %v816_v22  ;;  %v824_v38 = vrot.slane %v810_v32, %v816_v22 }
 0x192   : > { %v825_v40 = vcombine.low %v817_v37, %v824_v38 }
 0x194   : > { %v869_v41 = vadd.f32 %v867_v39, %v825_v40 }
 0x196   : > { %v1132_v42 = vmul.f32 -1.442695, %v869_v41  ;;  %v877_v43 = vrot.slane %v869_v41, 2  ;;  %v888_v45 = vrot.slane %v869_v41, 6  ;;  %v885_v48 = vrot.slane %v869_v41, 4 }
 0x198   : > { %1325 = vpow2.f32 %v1132_v42  ;;  %v1133_v44 = vmul.f32 -1.442695, %v877_v43  ;;  %v1134_v46 = vmul.f32 -1.442695, %v888_v45 }
 0x19a   : > { %1327 = vpow2.f32 %v1133_v44 }
 0x19b   : > { %1329 = vpow2.f32 %v1134_v46 }
 0x1a2   : > { %v1326_v47 = vpop.eup %1325 }
 0x1a3   : > { %v873_v49 = vadd.f32 1.0, %v1326_v47 }
 0x1a4   : > { %v1328_v50 = vpop.eup %1327 }
 0x1a5   : > { %1331 = vrcp.f32 %v873_v49  ;;  %v882_v51 = vadd.f32 1.0, %v1328_v50  ;;  %v1330_v52 = vpop.eup %1329 }
 0x1a6   : > { %1333 = vtanh.f32 %v885_v48  ;;  %v893_v57 = vadd.f32 1.0, %v1330_v52 }
 0x1a7   : > { %1335 = vrcp.f32 %v882_v51 }
 0x1a8   : > { %1337 = vrcp.f32 %v893_v57 }
 0x1af   : > { %v1332_v53 = vpop.eup %1331 }
 0x1b0   : > { %v1334_v55 = vpop.eup %1333 }
 0x1b1   : > { %v1336_v56 = vpop.eup %1335  ;;  %v904_v58 = vmul.f32 %v1334_v55, %v1332_v53 }
 0x1b2   : > { %v903_v59 = vmul.f32 %v1336_v56, %v1135_v54  ;;  %v1338_v61 = vpop.eup %1337 }
 0x1b4   : > { %v905_v60 = vadd.f32 %v904_v58, %v903_v59 }
 0x1b6   : > { %906 = vst [vmem:[%s299_s22] sm:$0x3] %v905_v60  ;;  %1339 = vtanh.f32 %v905_v60 }
 0x1c0   : > { %v1340_v62 = vpop.eup %1339 }
 0x1c1   : > { %v908_v63 = vmul.f32 %v1340_v62, %v1338_v61 }
 0x1c3   : > { %1136 = vst [vmem:[%s299_s22 + $0x2] sm:$0x3] %v908_v63 }
 0x1c4   : > { %1442 = shalt.err (!%p1439_p12)
}
 0x1c5   : > { %s1443_s13 = scalar_lea.hbm %s1846_s6, 64  ;;  %s1447_s26 = scalar_lea.hbm %s1901_s4, 128 }
 0x1c6   : > { %p1444_p10 = scmp.ne.s32.totalorder %s1846_s6, %s1443_s13  ;;  %p1448_p11 = scmp.lt.u32.totalorder %s1846_s6, %s1901_s4 }
 0x1c7   : > { %p1449_p0 = scmp.lt.u32.totalorder %s1447_s26, %s1443_s13  ;;  %p1451_p13 = scmp.lt.u32.totalorder %s1443_s13, %s1846_s6 }
 0x1c8   : > { %p1445_p9 = pnand %p1444_p10, %p1922_p4 }
 0x1c9   : > { %p1450_p8 = por %p1449_p0, %p1448_p11 }
 0x1ca   : > { %p1446_p6 = pneg %p1445_p9 }
 0x1cb   : > { %p1452_p7 = por %p1451_p13, %p1450_p8 }
 0x1cd   : > { %p1453_p1 = pnand %p1452_p7, %p1446_p6 }
 0x1cf   : > { %1456 = shalt.err (!%p1453_p1)
}
 0x1d0   : > { %s1526_s28 = smov 32   ;;  %s1527_s7 = smov 64  }
 0x1d1   : > { %s1528_s22 = smov 2  }
 0x1d2   : > { %1151 = dma.vmem_to_hbm [thread:$0]  (%p1922_p4), %s1848_s30, 64, %s1846_s6, %s912_s2, %s1526_s28, %s1527_s7, %s1528_s22  }
 0x1d3 PF: > { %s939_s29 = sand.u32 1, %s1495_s15   ;;  %p1923_p3 = scmp.ne.s32.totalorder %s1915_s9, 0 }
 0x1d4   : > { %p1924_p2 = scmp.ge.s32.totalorder %s1515_s20, 2  ;;  %s940_s24 = scalar_lea.sflag [#allocation5], %s939_s29 }
 0x1d6   : > { %p1165_p5 = pnand %p1924_p2, %p1923_p3 }
 0x1d8   : > { %1490 = dma.done.wait (!%p1165_p5), %s940_s24, 64  }
 0x1d9   : > { %1492 = vsyncadd (!%p1165_p5), %s940_s24, 4294967232  ;;  %s21_s20 = sadd.s32 1, %s1515_s20   ;;  %s1925_s8 = sld [smem:[#allocation13_spill]] }
 0x1da   : > { %p18_p12 = scmp.ge.s32.totalorder %s21_s20, 4   ;;  %s1926_s15 = smov %s1499_s16 }
 0x1db   : > { %s1927_s16 = smov %s1503_s17  ;;  %s1928_s17 = smov %s1602_s27 }
 0x1dc   : > { %s1929_s18 = smov %s1511_s19  ;;  %20 = sbr.rel (!%p18_p12) target bundleno = 10 (0xa), region = 110 }
 0x1df   : > { %s1930_s19 = smov %s1925_s8 }
 0x1e3   :  { %945 = vsyncpa [#allocation4], 1 }
 0x1e4   :  { %947 = vsyncpa [#allocation4 + $0x1], 1 }
 0x1e5   :  { %948 = vsyncpa [#allocation7], 1 }
 0x1e6   :  { %950 = vsyncpa [#allocation7 + $0x1], 1 }
 0x1e7   :  { %951 = vsyncpa [#allocation5], 1 }
 0x1e8   :  { %953 = vsyncpa [#allocation5 + $0x1], 1 }

</bundles_post_ra>
